<compile_context>
chip_gen: v7x
topology: tpu7x:2x2x1
jax: 0.10.0
libtpu: 0.0.40
codegen_flags: <defaults>
</compile_context>

<pallas_src>
import functools

import jax
import jax.numpy as jnp
from jax.experimental import pallas as pl
from jax.experimental.pallas import tpu as pltpu


def _round_up(x, m):
    return ((x + m - 1) // m) * m


def _cdiv(a, b):
    return (a + b - 1) // b


def _tpu_vmem_capacity_bytes():
    """Physical per-core VMEM (128 MiB v5e/v6e, 64 MiB v7x); conservative fallback."""
    try:
        return int(pltpu.get_tpu_info().vmem_capacity_bytes)
    except Exception:
        return 64 * 1024 * 1024


def _est_vmem_bytes(tb, K, H, w_isz, w_bufs):
    """Working-set estimate including lane/sublane padding of VMEM tiles."""
    k_lane = _round_up(K, 128)
    h_lane = _round_up(H, 128)
    sub = 16 if w_isz == 2 else 8
    x_bytes = 2 * tb * k_lane * 4              # f32 state tile, double-buffered
    out_bytes = 2 * 8 * tb * 4                 # (1,1,tb) f32 output row (8-sublane pad)
    w_bytes = w_bufs * ((_round_up(K, sub) + _round_up(H, sub)) * h_lane * w_isz
                        + 3 * 8 * h_lane * 4 + 8 * 128 * 4)
    act_bytes = tb * h_lane * (4 + 4 + w_isz)  # h1(f32), h2(f32), bf16 copy of h1
    return x_bytes + out_bytes + w_bytes + act_bytes


def _value_mlp_kernel(x_ref, w1_ref, b1_ref, w2_ref, b2_ref, w3_ref, b3_ref,
                      o_ref, *, matmul_dtype):
    """Forward pass for one batch tile, entirely in VMEM.

    x_ref : (tb, K) f32 state tile (cast to matmul_dtype here, in VMEM)
    w1    : (K, H)  matmul dtype    b1 : (1, H) f32
    w2    : (H, H)  matmul dtype    b2 : (1, H) f32
    w3    : (1, H)  f32 (head stays on the VPU)     b3 : (1, 1) f32
    o_ref : (1, 1, tb) lane-dense output row (batch along lanes)
    """
    x = x_ref[...].astype(matmul_dtype)        # in-VMEM cast: no wrapper HBM pass
    # Layer 1: MXU matmul, f32 accumulation; bias + ReLU in f32 on the VPU.
    h1 = jnp.dot(x, w1_ref[...], preferred_element_type=jnp.float32)
    h1 = jnp.maximum(h1 + b1_ref[...], 0.0)
    # Layer 2.
    h2 = jnp.dot(h1.astype(matmul_dtype), w2_ref[...],
                 preferred_element_type=jnp.float32)
    h2 = jnp.maximum(h2 + b2_ref[...], 0.0)
    # Head (H -> 1): VPU multiply + XLU lane reduction instead of an N=1 MXU
    # matmul; result written batch-along-lanes for dense stores.
    # (Low-priority perf note from review: if a bundle dump shows the
    #  sublane->lane relayout of `v` materializing a VMEM round-trip instead of
    #  landing on the XLU slot, restructure this store per 8-row chunk.)
    v = jnp.sum(h2 * w3_ref[...], axis=-1)            # (tb,)
    row = v[None, :] + b3_ref[...]                    # (1, tb)
    o_ref[...] = row[None].astype(o_ref.dtype)        # (1, 1, tb)


@functools.partial(jax.jit,
                   static_argnames=("block_b", "matmul_dtype",
                                    "single_buffer_weights"))
def value_function_forward(state, params, *, block_b=1024,
                           matmul_dtype=jnp.bfloat16,
                           single_buffer_weights=None):
    """Pallas ValueFunction forward. state: (B, state_dim) -> (B,) float32."""
    w1, b1, w2, b2, w3, b3 = params
    B, K = state.shape
    H = w1.shape[1]

    w_isz = jnp.dtype(matmul_dtype).itemsize
    cap = _tpu_vmem_capacity_bytes()
    budget = (3 * cap) // 4                    # leave headroom for compiler scratch

    # Single-buffer the grid-resident weights only when the dead second copy is
    # material (large hidden_dim under v7x's 64 MiB VMEM).  At small H the
    # default double buffer is noise and we keep the plain spec.
    if single_buffer_weights is None:
        sub = 16 if w_isz == 2 else 8
        w_resident = ((_round_up(K, sub) + _round_up(H, sub))
                      * _round_up(H, 128) * w_isz)
        single_buffer_weights = w_resident > cap // 16
    w_bufs = 1 if single_buffer_weights else 2

    # Batch tile: 128-multiple (lane-dense stores, full MXU rows), never larger
    # than the batch (no jnp.pad copy -- the ragged last grid block reads
    # unspecified rows that get sliced off), split into >=2 parallel grid steps
    # when B >= 256 (v7x dual-TensorCore; negligible cost on v5e/v6e), and
    # clamped against the per-generation VMEM capacity.
    if B < 128:
        tb = B                                 # one exact block; masked stores OK here
    else:
        tb = max(128, (block_b // 128) * 128)
        tb = min(tb, (B // 128) * 128)
        if B >= 256:
            tb = min(tb, _round_up(_cdiv(B, 2), 128))
        while tb > 128 and _est_vmem_bytes(tb, K, H, w_isz, w_bufs) > budget:
            tb -= 128
    grid = _cdiv(B, tb)

    # Per-call weight casts are tiny vs. the B*K state pass; store params in
    # bf16 once in production and these become no-ops.
    w1c = w1.astype(matmul_dtype)
    w2c = w2.astype(matmul_dtype)
    b1f = b1.reshape(1, H).astype(jnp.float32)
    b2f = b2.reshape(1, H).astype(jnp.float32)
    w3_row = w3.reshape(1, H).astype(jnp.float32)      # head stays f32 (VPU)
    b3f = b3.reshape(1, 1).astype(jnp.float32)

    full = lambda i: (0, 0)                    # weights/biases are grid-resident
    w_kw = ({"pipeline_mode": pl.Buffered(buffer_count=1)}
            if single_buffer_weights else {})

    est = _est_vmem_bytes(tb, K, H, w_isz, w_bufs)
    vmem_limit = int(min(cap, max(32 * 1024 * 1024, est * 5 // 4)))

    cost = pl.CostEstimate(
        flops=2 * grid * tb * (K * H + H * H + H),
        transcendentals=0,
        bytes_accessed=(B * K * 4 + (K * H + H * H) * w_isz
                        + (3 * H + 1) * 4 + grid * tb * 4))

    out = pl.pallas_call(
        functools.partial(_value_mlp_kernel, matmul_dtype=matmul_dtype),
        out_shape=jax.ShapeDtypeStruct((grid, 1, tb), jnp.float32),
        grid_spec=pltpu.PrefetchScalarGridSpec(
            num_scalar_prefetch=0,
            grid=(grid,),
            in_specs=[
                pl.BlockSpec((tb, K), lambda i: (i, 0)),        # state tile (f32)
                pl.BlockSpec((K, H), full, **w_kw),             # w1
                pl.BlockSpec((1, H), full, **w_kw),             # b1
                pl.BlockSpec((H, H), full, **w_kw),             # w2
                pl.BlockSpec((1, H), full, **w_kw),             # b2
                pl.BlockSpec((1, H), full, **w_kw),             # w3 (as a row)
                pl.BlockSpec((1, 1), full, **w_kw),             # b3
            ],
            out_specs=pl.BlockSpec((1, 1, tb), lambda i: (i, 0, 0)),
        ),
        compiler_params=pltpu.CompilerParams(
            dimension_semantics=("parallel",),
            vmem_limit_bytes=vmem_limit),
        cost_estimate=cost,
    )(state, w1c, b1f, w2c, b2f, w3_row, b3f)

    # squeeze_output=True in the PyTorch mlp(): lane-dense rows -> (B,)
    v = out.reshape(-1)
    if grid * tb != B:
        v = v[:B]
    return v


def init_value_function_params(key, state_dim, hidden_dim=256, n_hidden=2):
    """Deterministic synthetic init matching the module's layer shapes."""
    assert n_hidden == 2, "this script mirrors the default n_hidden=2 topology"
    dims = [state_dim, hidden_dim, hidden_dim, 1]
    keys = jax.random.split(key, 2 * (len(dims) - 1))
    params = []
    for li in range(len(dims) - 1):
        fan_in, fan_out = dims[li], dims[li + 1]
        bound = 1.0 / jnp.sqrt(jnp.float32(fan_in))  # PyTorch Linear default
        w = jax.random.uniform(keys[2 * li], (fan_in, fan_out),
                               minval=-bound, maxval=bound, dtype=jnp.float32)
        b = jax.random.uniform(keys[2 * li + 1], (1, fan_out),
                               minval=-bound, maxval=bound, dtype=jnp.float32)
        params += [w, b]
    return tuple(params)


def _reference_forward(state, params):
    w1, b1, w2, b2, w3, b3 = params
    h = jnp.maximum(state @ w1 + b1, 0.0)
    h = jnp.maximum(h @ w2 + b2, 0.0)
    return (h @ w3 + b3)[:, 0]


if __name__ == "__main__":
    key = jax.random.PRNGKey(0)
    k_params, k_state = jax.random.split(key)

    batch, state_dim, hidden_dim = 200, 16, 32
    params = init_value_function_params(k_params, state_dim, hidden_dim)
    state = jax.random.normal(k_state, (batch, state_dim), dtype=jnp.float32)

    v_ref = _reference_forward(state, params)

    # Default path: bf16 MXU operands, f32 accumulation / bias / ReLU / head.
    # Exercises the no-pad ragged last block (200 rows -> two 128-row tiles).
    v = jax.block_until_ready(value_function_forward(state, params))
    assert v.shape == (batch,)
    assert jnp.allclose(v, v_ref, atol=1e-1, rtol=1e-1), "bf16 path mismatch"

    # Exact f32 path (keep available for loss-critical evaluation).
    v_f32 = jax.block_until_ready(
        value_function_forward(state, params, matmul_dtype=jnp.float32))
    assert v_f32.shape == (batch,)
    assert jnp.allclose(v_f32, v_ref, atol=1e-5, rtol=1e-5), "f32 path mismatch"

    print("KERNEL_OK")
</pallas_src>

<mosaic_0001>
module attributes {stable_mosaic.version = 11 : i64} {
  func.func @_value_mlp_kernel(%arg0: i32, %arg1: memref<128x16xf32, #tpu.memory_space<vmem>>, %arg2: memref<16x32xbf16, #tpu.memory_space<vmem>>, %arg3: memref<1x32xf32, #tpu.memory_space<vmem>>, %arg4: memref<32x32xbf16, #tpu.memory_space<vmem>>, %arg5: memref<1x32xf32, #tpu.memory_space<vmem>>, %arg6: memref<1x32xf32, #tpu.memory_space<vmem>>, %arg7: memref<1x1xf32, #tpu.memory_space<vmem>>, %arg8: memref<1x1x128xf32, #tpu.memory_space<vmem>>) attributes {dimension_semantics = [#tpu.dimension_semantics<parallel>], iteration_bounds = array<i64: 2>, scalar_prefetch = 0 : i64, scratch_operands = 0 : i64, tpu.core_type = #tpu.core_type<tc>, window_params = [{transform_indices = @transform_0, window_bounds = array<i64: 128, 16>}, {pipeline_mode = #tpu.pipeline_mode<synchronous>, transform_indices = @transform_1, window_bounds = array<i64: 16, 32>}, {pipeline_mode = #tpu.pipeline_mode<synchronous>, transform_indices = @transform_2, window_bounds = array<i64: 1, 32>}, {pipeline_mode = #tpu.pipeline_mode<synchronous>, transform_indices = @transform_3, window_bounds = array<i64: 32, 32>}, {pipeline_mode = #tpu.pipeline_mode<synchronous>, transform_indices = @transform_4, window_bounds = array<i64: 1, 32>}, {pipeline_mode = #tpu.pipeline_mode<synchronous>, transform_indices = @transform_5, window_bounds = array<i64: 1, 32>}, {pipeline_mode = #tpu.pipeline_mode<synchronous>, transform_indices = @transform_6, window_bounds = array<i64: 1, 1>}, {transform_indices = @transform_7, window_bounds = array<i64: 1, 1, 128>}]} {
    %c0 = arith.constant 0 : index
    %c0_0 = arith.constant 0 : index
    %0 = vector.load %arg1[%c0, %c0_0] : memref<128x16xf32, #tpu.memory_space<vmem>>, vector<128x16xf32>
    %1 = arith.truncf %0 : vector<128x16xf32> to vector<128x16xbf16>
    %c0_1 = arith.constant 0 : index
    %c0_2 = arith.constant 0 : index
    %2 = vector.load %arg2[%c0_1, %c0_2] : memref<16x32xbf16, #tpu.memory_space<vmem>>, vector<16x32xbf16>
    %cst = arith.constant dense<0.000000e+00> : vector<128x32xf32>
    %3 = tpu.matmul %1, %2, %cst {dimension_numbers = #tpu.dot_dimension_numbers<[1], [0], [0], [1], [0, 0, 1, 1], [], []>} : vector<128x16xbf16>, vector<16x32xbf16>, vector<128x32xf32> -> vector<128x32xf32>
    %c0_3 = arith.constant 0 : index
    %c0_4 = arith.constant 0 : index
    %4 = vector.load %arg3[%c0_3, %c0_4] : memref<1x32xf32, #tpu.memory_space<vmem>>, vector<1x32xf32>
    %5 = vector.broadcast %4 : vector<1x32xf32> to vector<128x32xf32>
    %6 = arith.addf %3, %5 : vector<128x32xf32>
    %cst_5 = arith.constant 0.000000e+00 : f32
    %7 = vector.broadcast %cst_5 : f32 to vector<128x32xf32>
    %8 = arith.maximumf %6, %7 : vector<128x32xf32>
    %9 = arith.truncf %8 : vector<128x32xf32> to vector<128x32xbf16>
    %c0_6 = arith.constant 0 : index
    %c0_7 = arith.constant 0 : index
    %10 = vector.load %arg4[%c0_6, %c0_7] : memref<32x32xbf16, #tpu.memory_space<vmem>>, vector<32x32xbf16>
    %cst_8 = arith.constant dense<0.000000e+00> : vector<128x32xf32>
    %11 = tpu.matmul %9, %10, %cst_8 {dimension_numbers = #tpu.dot_dimension_numbers<[1], [0], [0], [1], [0, 0, 1, 1], [], []>} : vector<128x32xbf16>, vector<32x32xbf16>, vector<128x32xf32> -> vector<128x32xf32>
    %c0_9 = arith.constant 0 : index
    %c0_10 = arith.constant 0 : index
    %12 = vector.load %arg5[%c0_9, %c0_10] : memref<1x32xf32, #tpu.memory_space<vmem>>, vector<1x32xf32>
    %13 = vector.broadcast %12 : vector<1x32xf32> to vector<128x32xf32>
    %14 = arith.addf %11, %13 : vector<128x32xf32>
    %cst_11 = arith.constant 0.000000e+00 : f32
    %15 = vector.broadcast %cst_11 : f32 to vector<128x32xf32>
    %16 = arith.maximumf %14, %15 : vector<128x32xf32>
    %c0_12 = arith.constant 0 : index
    %c0_13 = arith.constant 0 : index
    %17 = vector.load %arg6[%c0_12, %c0_13] : memref<1x32xf32, #tpu.memory_space<vmem>>, vector<1x32xf32>
    %18 = vector.broadcast %17 : vector<1x32xf32> to vector<128x32xf32>
    %19 = arith.mulf %16, %18 : vector<128x32xf32>
    %cst_14 = arith.constant dense<0.000000e+00> : vector<128xf32>
    %20 = vector.multi_reduction <add>, %19, %cst_14 [1] : vector<128x32xf32> to vector<128xf32>
    %21 = vector.shape_cast %20 : vector<128xf32> to vector<1x128xf32>
    %c0_15 = arith.constant 0 : index
    %c0_16 = arith.constant 0 : index
    %22 = vector.load %arg7[%c0_15, %c0_16] : memref<1x1xf32, #tpu.memory_space<vmem>>, vector<1x1xf32>
    %23 = vector.broadcast %22 : vector<1x1xf32> to vector<1x128xf32>
    %24 = arith.addf %21, %23 : vector<1x128xf32>
    %25 = vector.shape_cast %24 : vector<1x128xf32> to vector<1x1x128xf32>
    %c0_17 = arith.constant 0 : index
    %c0_18 = arith.constant 0 : index
    %c0_19 = arith.constant 0 : index
    %26 = vector.load %arg8[%c0_17, %c0_18, %c0_19] : memref<1x1x128xf32, #tpu.memory_space<vmem>>, vector<1x1x128xf32>
    tpu.vector_store %arg8[%c0_17, %c0_18, %c0_19], %25 {strides = array<i32>} : memref<1x1x128xf32, #tpu.memory_space<vmem>>, vector<1x1x128xf32>,
    return
  }
  func.func @transform_0(%arg0: i32) -> (i32, i32) {
    %c0_i32 = arith.constant 0 : i32
    %c0_i32_0 = arith.constant 0 : i32
    return %arg0, %c0_i32 : i32, i32
  }
  func.func @transform_1(%arg0: i32) -> (i32, i32) {
    %c0_i32 = arith.constant 0 : i32
    %c0_i32_0 = arith.constant 0 : i32
    %c0_i32_1 = arith.constant 0 : i32
    return %c0_i32, %c0_i32_0 : i32, i32
  }
  func.func @transform_2(%arg0: i32) -> (i32, i32) {
    %c0_i32 = arith.constant 0 : i32
    %c0_i32_0 = arith.constant 0 : i32
    %c0_i32_1 = arith.constant 0 : i32
    return %c0_i32, %c0_i32_0 : i32, i32
  }
  func.func @transform_3(%arg0: i32) -> (i32, i32) {
    %c0_i32 = arith.constant 0 : i32
    %c0_i32_0 = arith.constant 0 : i32
    %c0_i32_1 = arith.constant 0 : i32
    return %c0_i32, %c0_i32_0 : i32, i32
  }
  func.func @transform_4(%arg0: i32) -> (i32, i32) {
    %c0_i32 = arith.constant 0 : i32
    %c0_i32_0 = arith.constant 0 : i32
    %c0_i32_1 = arith.constant 0 : i32
    return %c0_i32, %c0_i32_0 : i32, i32
  }
  func.func @transform_5(%arg0: i32) -> (i32, i32) {
    %c0_i32 = arith.constant 0 : i32
    %c0_i32_0 = arith.constant 0 : i32
    %c0_i32_1 = arith.constant 0 : i32
    return %c0_i32, %c0_i32_0 : i32, i32
  }
  func.func @transform_6(%arg0: i32) -> (i32, i32) {
    %c0_i32 = arith.constant 0 : i32
    %c0_i32_0 = arith.constant 0 : i32
    %c0_i32_1 = arith.constant 0 : i32
    return %c0_i32, %c0_i32_0 : i32, i32
  }
  func.func @transform_7(%arg0: i32) -> (i32, i32, i32) {
    %c0_i32 = arith.constant 0 : i32
    %c0_i32_0 = arith.constant 0 : i32
    %c0_i32_1 = arith.constant 0 : i32
    return %arg0, %c0_i32, %c0_i32_0 : i32, i32, i32
  }
}

</mosaic_0001>

<bundles_post_ra>
// kernel: value_function_forward.1
= control target key start
LH: loop header
LB: loop body
LE: loop exit
PB: predicated region body
PF: predicated region fallthrough
CT: control target
= control target key end

     0   :  { %s1448_s0 = inlined_call_operand.vmem [shape: f32[200,16], index: 0, kind: input, shape index: {}]   ;;  %s1449_s1 = inlined_call_operand.vmem [shape: bf16[16,32], index: 1, kind: input, shape index: {}]   ;;  %s1450_s2 = inlined_call_operand.vmem [shape: f32[1,32], index: 2, kind: input, shape index: {}]   ;;  %s1451_s3 = inlined_call_operand.vmem [shape: bf16[32,32], index: 3, kind: input, shape index: {}]   ;;  %s1452_s4 = inlined_call_operand.vmem [shape: f32[1,32], index: 4, kind: input, shape index: {}]   ;;  %s1453_s5 = inlined_call_operand.vmem [shape: f32[1,32], index: 5, kind: input, shape index: {}]   ;;  %s1454_s6 = inlined_call_operand.<no memory space> [shape: f32[1,1], index: 6, kind: input, shape index: {}]   ;;  %s1455_s7 = inlined_call_operand.hbm [shape: f32[2,1,128], index: 7, kind: output, shape index: {}]  }
   0x1   :  { %v12_v0 = vstv %s1454_s6 }
   0x2   :  { %13 = vst [vmem:[#allocation2] sm:$0x1] %v12_v0 }
   0x3   :  { %14 = vsyncpa [#allocation4], 0 }
   0x4   :  { %16 = vsyncpa [#allocation4 + $0x1], 0  ;;  %s1183_s26 = smov 0   ;;  %s1185_s27 = smov 0  }
   0x5   :  { %s1187_s28 = smov 0   ;;  %s1189_s29 = smov 0  }
   0x6 LB: > { %s940_s6 = sadd.s32 4294967295, %s1136_s29   ;;  %s941_s30 = sadd.s32 4294967294, %s1136_s29   ;;  %s1136_s29 = sphi %s1189_s29, %s1461_s29   ;;  %s1132_s28 = sphi %s1187_s28, %s1460_s28   ;;  %s1128_s27 = sphi %s1185_s27, %s1459_s27   ;;  %s1124_s26 = sphi %s1183_s26, %s1458_s26  }
   0x7   : > { %s1206_s8 = sadd.s32 1, %s1136_s29   ;;  %s181_s9 = sadd.s32 1, %s1132_s28 }
   0x8   : > { %s178_s10 = ssub.s32 %s1136_s29, %s1206_s8  ;;  %p191_p0 = scmp.ne.s32.totalorder %s1132_s28, %s1128_s27 }
   0x9   : > { %p179_p1 = scmp.eq.s32.totalorder %s178_s10, 0  ;;  %p192_p2 = scmp.eq.s32.totalorder %s940_s6, 1 }
   0xa   : > { %p197_p3 = scmp.ne.s32.totalorder %s1128_s27, %s1124_s26  ;;  %p198_p4 = scmp.eq.s32.totalorder %s941_s30, 1 }
   0xb   : > { %s1216_s11 = scalar_select %p179_p1, %s1132_s28, %s181_s9  }
   0xc   : > { %p1218_p5 = por %p192_p2, %p191_p0  ;;  %p1222_p6 = por %p198_p4, %p197_p3 }
   0xd   : > { %p944_p7 = scmp.ge.s32.totalorder %s1136_s29, 1  ;;  %p251_p8 = scmp.lt.s32.totalorder %s1136_s29, 3 }
   0xf   : > { %p252_p9 = pnand %p944_p7, %p251_p8 }
  0x10   : > { %v1071_v1 = vld [vmem:[%s1449_s1] sm:$0xff] (!%p252_p9)   ;;  %s1231_s16 = sshll.u32 (!%p252_p9), %s940_s6, 4  ;;  %vm340_vm0 = vcmask (!%p252_p9), 130048   ;;  %v1073_v27 = vld [vmem:[%s1451_s3 + $0x8] sm:$0xff] (!%p252_p9)   ;;  %vm509_vm1 = vcmask (!%p252_p9), 261120   ;;  %vm771_vm2 = vcmask (!%p252_p9), 130112  }
  0x11   : > { %255 = sbr.rel (%p252_p9) target bundleno = 702 (0x2be), region = 48  ;;  %p291_p10 = scmp.lt.s32.totalorder (!%p252_p9), %s1231_s16, 24  ;;  %991 = vmatprep.subr.bf16.mxu0 (!%p252_p9), %v1071_v1  ;;  %v1072_v26 = vld [vmem:[%s1451_s3] sm:$0xff] (!%p252_p9)   ;;  %vm778_vm3 = vcmask (!%p252_p9), 195712   ;;  %vm785_vm4 = vcmask (!%p252_p9), 261312   ;;  %vm792_vm5 = vcmask (!%p252_p9), 326912  }
  0x12   : > { %992 = vmatpush3.bf16.msra.mxu0 (!%p252_p9), %v1071_v1  ;;  %1009 = vmatprep.subr.bf16.mxu1 (!%p252_p9), %v1072_v26  ;;  %v947_v28 = vld [vmem:[%s1450_s2] ss:$0 sm:$0xff] (!%p252_p9)  ;;  %vm799_vm6 = vcmask (!%p252_p9), 392512   ;;  %vm806_vm7 = vcmask (!%p252_p9), 458112   ;;  %vm813_vm8 = vcmask (!%p252_p9), 523712   ;;  %vm820_vm9 = vcmask (!%p252_p9), 589312   ;;  %s1404_s22 = scalar_lea.hbm (!%p252_p9), %s1455_s7, %s1231_s16 }
  0x13   : > { %1010 = vmatpush3.bf16.msra.mxu1 (!%p252_p9), %v1072_v26  ;;  %vm827_vm10 = vcmask (!%p252_p9), 654912   ;;  %vm834_vm11 = vcmask (!%p252_p9), 720512   ;;  %vm841_vm12 = vcmask (!%p252_p9), 786112   ;;  %vm848_vm13 = vcmask (!%p252_p9), 851712   ;;  %s1139_s25 = smov (!%p252_p9), [#allocation3]  }
  0x14   : > { %1011 = vmatprep.subr.bf16.mxu1 (!%p252_p9), %v1073_v27  ;;  %vm855_vm14 = vcmask (!%p252_p9), 917312   ;;  %vm862_vm15 = vcmask (!%p252_p9), 982912   ;;  %s1078_s6 = sshll.u32 (!%p252_p9), %s1139_s25, 4  ;;  %s1079_s6 = int_to_ptr.vmem [resolvable:$false] %s1078_s6 }
  0x15   : > { %s1080_s30 = scalar_lea.vmem (!%p252_p9), %s1079_s6, 32 }
  0x17   : > { %1012 = vmatpush3.bf16.msra.mxu1 (!%p252_p9), %v1073_v27 }
  0x18   : > { %s292_s17 = scalar_select %p291_p10, %s1231_s16, 24 }
  0x1a   : > { %s946_s18 = sshll.u32 %s292_s17, 3  ;;  %s284_s17 = sand.u32 1, %s1128_s27  }
  0x1b   : > { %s1238_s21 = scalar_lea.vmem %s1448_s0, %s946_s18  ;;  %s285_s18 = scalar_lea.vmem [#allocation3], %s284_s17 }
  0x1c   : > { %v301_v2 = vld [vmem:[%s1238_s21] sm:$0xff]  ;;  %v302_v3 = vld [vmem:[%s1238_s21 + $0x8] sm:$0xff]  ;;  %v303_v4 = vld [vmem:[%s1238_s21 + $0x10] sm:$0xff]  ;;  %s886_s19 = sshll.u32 %s285_s18, 4  ;;  %s874_s23 = scalar_lea.sflag [#allocation4], %s284_s17  ;;  %s1406_s19 = int_to_ptr.vmem [resolvable:$true] %s886_s19 }
  0x1d   : > { %v317_v5 = vpack.c.bf16 %v302_v3, %v301_v2  ;;  %v304_v6 = vld [vmem:[%s1238_s21 + $0x18] sm:$0xff]  ;;  %v305_v7 = vld [vmem:[%s1238_s21 + $0x20] sm:$0xff]  ;;  %v306_v8 = vld [vmem:[%s1238_s21 + $0x28] sm:$0xff]  ;;  %s1074_s24 = scalar_lea.vmem %s1406_s19, 16  ;;  %p1081_p0 = scmp.lt.s32.totalorder %s1406_s19, %s1079_s6 }
  0x1e   : > { %v318_v9 = vpack.c.bf16 %v304_v6, %v303_v4  ;;  %v319_v10 = vpack.c.bf16 %v306_v8, %v305_v7  ;;  %v307_v11 = vld [vmem:[%s1238_s21 + $0x30] sm:$0xff]  ;;  %v308_v12 = vld [vmem:[%s1238_s21 + $0x38] sm:$0xff]  ;;  %v309_v13 = vld [vmem:[%s1238_s21 + $0x40] sm:$0xff]  ;;  %p1075_p11 = scmp.ne.s32.totalorder %s1406_s19, %s1074_s24  ;;  %p1082_p1 = scmp.lt.s32.totalorder %s1080_s30, %s1074_s24 }
  0x1f   : > { %993 = vmatprep.mubr.msk.bf16.mxu0 %vm340_vm0, %v317_v5  ;;  %v310_v14 = vld [vmem:[%s1238_s21 + $0x48] sm:$0xff]  ;;  %v320_v15 = vpack.c.bf16 %v308_v12, %v307_v11  ;;  %v311_v17 = vld [vmem:[%s1238_s21 + $0x50] sm:$0xff]  ;;  %v312_v18 = vld [vmem:[%s1238_s21 + $0x58] sm:$0xff] }
  0x20   : > { %994 = vmatmul.mubr.msk.bf16.vlgmr.msra.gmra.mrb[0].mxu0 %vm340_vm0, %v318_v9  ;;  %v321_v16 = vpack.c.bf16 %v310_v14, %v309_v13  ;;  %v313_v19 = vld [vmem:[%s1238_s21 + $0x60] sm:$0xff]  ;;  %v314_v20 = vld [vmem:[%s1238_s21 + $0x68] sm:$0xff]  ;;  %v322_v21 = vpack.c.bf16 %v312_v18, %v311_v17  ;;  %v315_v23 = vld [vmem:[%s1238_s21 + $0x70] sm:$0xff]  ;;  %p1076_p12 = pnand %p1075_p11, %p1218_p5  ;;  %p1083_p2 = por %p1082_p1, %p1081_p0 }
  0x21   : > { %997 = vmatprep.mubr.msk.bf16.mxu0 %vm340_vm0, %v319_v10  ;;  %v323_v22 = vpack.c.bf16 %v314_v20, %v313_v19  ;;  %v316_v24 = vld [vmem:[%s1238_s21 + $0x78] sm:$0xff] }
  0x22   : > { %v324_v25 = vpack.c.bf16 %v316_v24, %v315_v23  ;;  %p1077_p13 = pneg %p1076_p12 }
  0x24   : > { %p1084_p3 = pnand %p1083_p2, %p1077_p13 }
  0x28   : > { %998 = vmatmul.mubr.msk.bf16.gmra.mrb[4].mxu0 %vm340_vm0, %v320_v15 }
  0x29   : > { %1001 = vmatprep.mubr.msk.bf16.mxu0 %vm340_vm0, %v321_v16 }
  0x30   : > { %1002 = vmatmul.mubr.msk.bf16.gmra.mrb[8].mxu0 %vm340_vm0, %v322_v21  ;;  %v1138_v21 = vmov 0  }
  0x31   : > { %1005 = vmatprep.mubr.msk.bf16.mxu0 %vm340_vm0, %v323_v22  ;;  %1069 = vset.pattern.permute.xlu1 %v1138_v21  ;;  %v1284_v22 = vld [vmem:[%s1452_s4] ss:$0 sm:$0xff] }
  0x32   : > { %1070 = vset.pattern.permute.xlu0 %v1138_v21 }
  0x38   : > { %1006 = vmatmul.mubr.msk.bf16.gmra.mrb[12].mxu0 %vm340_vm0, %v324_v25  ;;  %vm869_vm0 = vcmask 1048512  }
  0xf3   : > { %v995_v29 = vpop.f32.mrb[0].mxu0 }
  0xf4   : > { %v408_v30 = vadd.f32 %v995_v29, %v947_v28  ;;  %v399_v31 = vpop.f32.mrb[1].mxu0 }
  0xf5   : > { %v400_v32 = vadd.f32 %v947_v28, %v399_v31  ;;  %v996_v33 = vpop.f32.mrb[2].mxu0 }
  0xf6   : > { %v411_v34 = vadd.f32 %v996_v33, %v947_v28  ;;  %v402_v35 = vpop.f32.mrb[3].mxu0  ;;  %v464_v37 = vmax.f32 %v408_v30, 0.0 }
  0xf7   : > { %v403_v36 = vadd.f32 %v947_v28, %v402_v35  ;;  %v462_v39 = vmax.f32 %v400_v32, 0.0 }
  0xf8   : > { %v465_v38 = vmax.f32 %v411_v34, 0.0 }
  0xf9   : > { %v463_v40 = vmax.f32 %v403_v36, 0.0 }
  0xfa   : > { %v479_v41 = vpack.c.bf16 %v465_v38, %v464_v37 }
  0xfb   : > { %v999_v42 = vpop.f32.mrb[4].mxu0  ;;  %v478_v43 = vpack.c.bf16 %v463_v40, %v462_v39 }
  0xfc   : > { %v424_v44 = vadd.f32 %v999_v42, %v947_v28  ;;  %v415_v45 = vpop.f32.mrb[5].mxu0 }
  0xfd   : > { %v416_v46 = vadd.f32 %v947_v28, %v415_v45  ;;  %v1000_v47 = vpop.f32.mrb[6].mxu0  ;;  %1013 = vmatprep.mubr.msk.bf16.mxu1 %vm509_vm1, %v478_v43 }
  0xfe   : > { %v427_v48 = vadd.f32 %v1000_v47, %v947_v28  ;;  %v418_v49 = vpop.f32.mrb[7].mxu0  ;;  %1014 = vmatmul.mubr.msk.bf16.vlgmr.msra.gmra.mrb[0].mxu1 %vm509_vm1, %v479_v41  ;;  %v468_v51 = vmax.f32 %v424_v44, 0.0 }
  0xff   : > { %v419_v50 = vadd.f32 %v947_v28, %v418_v49  ;;  %v466_v53 = vmax.f32 %v416_v46, 0.0 }
 0x100   : > { %v469_v52 = vmax.f32 %v427_v48, 0.0 }
 0x101   : > { %v467_v54 = vmax.f32 %v419_v50, 0.0 }
 0x102   : > { %v481_v55 = vpack.c.bf16 %v469_v52, %v468_v51 }
 0x103   : > { %v480_v56 = vpack.c.bf16 %v467_v54, %v466_v53  ;;  %v1003_v57 = vpop.f32.mrb[8].mxu0 }
 0x104   : > { %v440_v58 = vadd.f32 %v1003_v57, %v947_v28  ;;  %v431_v59 = vpop.f32.mrb[9].mxu0 }
 0x105   : > { %1017 = vmatprep.mubr.msk.bf16.mxu1 %vm509_vm1, %v480_v56  ;;  %v432_v60 = vadd.f32 %v947_v28, %v431_v59  ;;  %v1004_v61 = vpop.f32.mrb[10].mxu0 }
 0x106   : > { %1018 = vmatmul.mubr.msk.bf16.gmra.mrb[4].mxu1 %vm509_vm1, %v481_v55  ;;  %v472_v62 = vmax.f32 %v440_v58, 0.0  ;;  %v443_v63 = vadd.f32 %v1004_v61, %v947_v28  ;;  %v434_v0 = vpop.f32.mrb[11].mxu0 }
 0x107   : > { %v470_v1 = vmax.f32 %v432_v60, 0.0  ;;  %v435_v2 = vadd.f32 %v947_v28, %v434_v0 }
 0x108   : > { %v473_v3 = vmax.f32 %v443_v63, 0.0 }
 0x109   : > { %v471_v4 = vmax.f32 %v435_v2, 0.0 }
 0x10a   : > { %v483_v5 = vpack.c.bf16 %v473_v3, %v472_v62 }
 0x10b   : > { %v482_v6 = vpack.c.bf16 %v471_v4, %v470_v1  ;;  %v1007_v7 = vpop.f32.mrb[12].mxu0 }
 0x10c   : > { %v456_v8 = vadd.f32 %v1007_v7, %v947_v28  ;;  %v447_v9 = vpop.f32.mrb[13].mxu0 }
 0x10d   : > { %1021 = vmatprep.mubr.msk.bf16.mxu1 %vm509_vm1, %v482_v6  ;;  %v448_v10 = vadd.f32 %v947_v28, %v447_v9  ;;  %v1008_v11 = vpop.f32.mrb[14].mxu0 }
 0x10e   : > { %1022 = vmatmul.mubr.msk.bf16.gmra.mrb[8].mxu1 %vm509_vm1, %v483_v5  ;;  %v476_v12 = vmax.f32 %v456_v8, 0.0  ;;  %v459_v13 = vadd.f32 %v1008_v11, %v947_v28  ;;  %v450_v14 = vpop.f32.mrb[15].mxu0 }
 0x10f   : > { %v474_v15 = vmax.f32 %v448_v10, 0.0  ;;  %v451_v16 = vadd.f32 %v947_v28, %v450_v14  ;;  %v1291_v28 = vld [vmem:[%s1453_s5] ss:$0 sm:$0xff] }
 0x110   : > { %v477_v17 = vmax.f32 %v459_v13, 0.0 }
 0x111   : > { %v475_v18 = vmax.f32 %v451_v16, 0.0 }
 0x112   : > { %v485_v19 = vpack.c.bf16 %v477_v17, %v476_v12 }
 0x113   : > { %v484_v20 = vpack.c.bf16 %v475_v18, %v474_v15 }
 0x115   : > { %1025 = vmatprep.mubr.msk.bf16.mxu1 %vm509_vm1, %v484_v20 }
 0x116   : > { %1026 = vmatmul.mubr.msk.bf16.gmra.mrb[12].mxu1 %vm509_vm1, %v485_v19 }
 0x1d1   : > { %v1015_v23 = vpop.f32.mrb[0].mxu1 }
 0x1d2   : > { %v577_v24 = vadd.f32 %v1015_v23, %v1284_v22  ;;  %v568_v25 = vpop.f32.mrb[1].mxu1 }
 0x1d3   : > { %v569_v26 = vadd.f32 %v1284_v22, %v568_v25  ;;  %v1016_v27 = vpop.f32.mrb[2].mxu1 }
 0x1d4   : > { %v633_v29 = vmax.f32 %v577_v24, 0.0  ;;  %v580_v30 = vadd.f32 %v1016_v27, %v1284_v22  ;;  %v571_v31 = vpop.f32.mrb[3].mxu1 }
 0x1d5   : > { %v631_v32 = vmax.f32 %v569_v26, 0.0  ;;  %v572_v33 = vadd.f32 %v1284_v22, %v571_v31  ;;  %v718_v26 = vld [vmem:[#allocation2] sm:$0x1] }
 0x1d6   : > { %v634_v34 = vmax.f32 %v580_v30, 0.0  ;;  %v656_v35 = vmul.f32 %v1291_v28, %v633_v29 }
 0x1d7   : > { %v632_v36 = vmax.f32 %v572_v33, 0.0  ;;  %v654_v37 = vmul.f32 %v1291_v28, %v631_v32 }
 0x1d8   : > { %v676_v38 = vsel %vm509_vm1, %v656_v35, 0.0  ;;  %v657_v39 = vmul.f32 %v1291_v28, %v634_v34 }
 0x1d9   : > { %677 = vadd.xlane.f32.xlu1 %v676_v38  ;;  %v1019_v40 = vpop.f32.mrb[4].mxu1  ;;  %v670_v41 = vsel %vm509_vm1, %v654_v37, 0.0  ;;  %v655_v42 = vmul.f32 %v1291_v28, %v632_v36 }
 0x1da   : > { %v593_v43 = vadd.f32 %v1019_v40, %v1284_v22  ;;  %v584_v44 = vpop.f32.mrb[5].mxu1  ;;  %671 = vadd.xlane.f32.xlu0 %v670_v41  ;;  %v679_v49 = vsel %vm509_vm1, %v657_v39, 0.0 }
 0x1db   : > { %v585_v45 = vadd.f32 %v1284_v22, %v584_v44  ;;  %v1020_v46 = vpop.f32.mrb[6].mxu1  ;;  %v673_v53 = vsel %vm509_vm1, %v655_v42, 0.0 }
 0x1dc   : > { %v637_v47 = vmax.f32 %v593_v43, 0.0  ;;  %v587_v48 = vpop.f32.mrb[7].mxu1  ;;  %v596_v51 = vadd.f32 %v1020_v46, %v1284_v22 }
 0x1dd   : > { %v635_v50 = vmax.f32 %v585_v45, 0.0  ;;  %v588_v52 = vadd.f32 %v1284_v22, %v587_v48  ;;  %680 = vadd.xlane.f32.xlu1 %v679_v49  ;;  %v724_v48 = vlaneseq }
 0x1de   : > { %674 = vadd.xlane.f32.xlu0 %v673_v53  ;;  %v660_v54 = vmul.f32 %v1291_v28, %v637_v47  ;;  %v638_v57 = vmax.f32 %v596_v51, 0.0 }
 0x1df   : > { %v636_v55 = vmax.f32 %v588_v52, 0.0  ;;  %v658_v60 = vmul.f32 %v1291_v28, %v635_v50  ;;  %v1339_v51 = vshrl.u32 %v724_v48, 7  ;;  %v1342_v52 = vand.u32 127, %v724_v48 }
 0x1e0   : > { %v688_v56 = vsel %vm509_vm1, %v660_v54, 0.0  ;;  %v661_v6 = vmul.f32 %v1291_v28, %v638_v57 }
 0x1e1   : > { %v659_v58 = vmul.f32 %v1291_v28, %v636_v55  ;;  %v1023_v59 = vpop.f32.mrb[8].mxu1  ;;  %v682_v5 = vsel %vm509_vm1, %v658_v60, 0.0  ;;  %v773_v57 = vadd.s32 4294967280, %v1342_v52 }
 0x1e2   : > { %689 = vadd.xlane.f32.xlu0 %v688_v56  ;;  %v609_v61 = vadd.f32 %v1023_v59, %v1284_v22  ;;  %v600_v62 = vpop.f32.mrb[9].mxu1  ;;  %v691_v12 = vsel %vm509_vm1, %v661_v6, 0.0  ;;  %v766_v56 = vadd.s32 4294967288, %v1342_v52  ;;  %v787_v6 = vadd.s32 4294967264, %v1342_v52 }
 0x1e3   : > { %v685_v63 = vsel %vm509_vm1, %v659_v58, 0.0  ;;  %v601_v0 = vadd.f32 %v1284_v22, %v600_v62  ;;  %v1024_v1 = vpop.f32.mrb[10].mxu1 }
 0x1e4   : > { %686 = vadd.xlane.f32.xlu1 %v685_v63  ;;  %v641_v2 = vmax.f32 %v609_v61, 0.0  ;;  %v612_v3 = vadd.f32 %v1024_v1, %v1284_v22  ;;  %v603_v4 = vpop.f32.mrb[11].mxu1  ;;  %v764_v61 = vsub.s32 %v1342_v52, %v1339_v51  ;;  %v769_v62 = vsub.s32 %v766_v56, %v1339_v51 }
 0x1e5   : > { %v639_v8 = vmax.f32 %v601_v0, 0.0  ;;  %v604_v9 = vadd.f32 %v1284_v22, %v603_v4  ;;  %v776_v0 = vsub.s32 %v773_v57, %v1339_v51 }
 0x1e6   : > { %683 = vadd.xlane.f32.xlu0 %v682_v5  ;;  %v642_v7 = vmax.f32 %v612_v3, 0.0  ;;  %v664_v10 = vmul.f32 %v1291_v28, %v641_v2  ;;  %v780_v3 = vadd.s32 4294967272, %v1342_v52 }
 0x1e7   : > { %v640_v15 = vmax.f32 %v604_v9, 0.0  ;;  %v662_v18 = vmul.f32 %v1291_v28, %v639_v8 }
 0x1e8   : > { %v665_v11 = vmul.f32 %v1291_v28, %v642_v7  ;;  %v700_v16 = vsel %vm509_vm1, %v664_v10, 0.0  ;;  %v783_v9 = vsub.s32 %v780_v3, %v1339_v51  ;;  %v794_v10 = vadd.s32 4294967256, %v1342_v52 }
 0x1e9   : > { %v1027_v13 = vpop.f32.mrb[12].mxu1  ;;  %v694_v23 = vsel %vm509_vm1, %v662_v18, 0.0  ;;  %v663_v25 = vmul.f32 %v1291_v28, %v640_v15 }
 0x1ea   : > { %692 = vadd.xlane.f32.xlu0 %v691_v12  ;;  %v616_v14 = vpop.f32.mrb[13].mxu1  ;;  %v625_v17 = vadd.f32 %v1027_v13, %v1284_v22  ;;  %v790_v13 = vsub.s32 %v787_v6, %v1339_v51 }
 0x1eb   : > { %v1028_v19 = vpop.f32.mrb[14].mxu1  ;;  %v617_v24 = vadd.f32 %v1284_v22, %v616_v14  ;;  %v697_v29 = vsel %vm509_vm1, %v663_v25, 0.0 }
 0x1ec   : > { %v619_v20 = vpop.f32.mrb[15].mxu1  ;;  %v645_v21 = vmax.f32 %v625_v17, 0.0  ;;  %v628_v32 = vadd.f32 %v1028_v19, %v1284_v22  ;;  %v797_v19 = vsub.s32 %v794_v10, %v1339_v51 }
 0x1ed   : > { %v643_v27 = vmax.f32 %v617_v24, 0.0  ;;  %v620_v30 = vadd.f32 %v1284_v22, %v619_v20  ;;  %v703_v22 = vsel %vm509_vm1, %v665_v11, 0.0 }
 0x1ee   : > { %701 = vadd.xlane.f32.xlu0 %v700_v16  ;;  %v668_v31 = vmul.f32 %v1291_v28, %v645_v21  ;;  %v646_v36 = vmax.f32 %v628_v32, 0.0  ;;  %v801_v16 = vadd.s32 4294967248, %v1342_v52 }
 0x1ef   : > { %v644_v33 = vmax.f32 %v620_v30, 0.0  ;;  %v666_v35 = vmul.f32 %v1291_v28, %v643_v27  ;;  %v822_v30 = vadd.s32 4294967224, %v1342_v52 }
 0x1f0   : > { %v712_v34 = vsel %vm509_vm1, %v668_v31, 0.0  ;;  %v669_v40 = vmul.f32 %v1291_v28, %v646_v36  ;;  %v804_v21 = vsub.s32 %v801_v16, %v1339_v51 }
 0x1f1   : > { %v706_v37 = vsel %vm509_vm1, %v666_v35, 0.0  ;;  %v667_v38 = vmul.f32 %v1291_v28, %v644_v33  ;;  %v726_v28 = vsub.s32 0, %v1339_v51 }
 0x1f2   : > { %695 = vadd.xlane.f32.xlu0 %v694_v23  ;;  %v715_v41 = vsel %vm509_vm1, %v669_v40, 0.0  ;;  %v808_v23 = vadd.s32 4294967240, %v1342_v52  ;;  %v829_v40 = vadd.s32 4294967216, %v1342_v52 }
 0x1f3   : > { %v709_v39 = vsel %vm509_vm1, %v667_v38, 0.0 }
 0x1f4   : > { %v811_v32 = vsub.s32 %v808_v23, %v1339_v51  ;;  %v832_v48 = vsub.s32 %v829_v40, %v1339_v51 }
 0x1f5   : > { %721 = vperm.xlu1 %1069, %v718_v26   ;;  %v815_v26 = vadd.s32 4294967232, %v1342_v52 }
 0x1f6   : > { %698 = vadd.xlane.f32.xlu0 %v697_v29 }
 0x1f7   : > { %v818_v35 = vsub.s32 %v815_v26, %v1339_v51 }
 0x1fa   : > { %713 = vadd.xlane.f32.xlu0 %v712_v34 }
 0x1fe   : > { %707 = vadd.xlane.f32.xlu0 %v706_v37  ;;  %v825_v37 = vsub.s32 %v822_v30, %v1339_v51 }
 0x202   : > { %710 = vadd.xlane.f32.xlu0 %v709_v39 }
 0x206   : > { %716 = vadd.xlane.f32.xlu0 %v715_v41 }
 0x219   : > { %704 = vadd.xlane.f32.xlu1 %v703_v22 }
 0x266   : > { %v678_v45 = vpop.xlane.xlu1 %677 }
 0x267   : > { %v672_v42 = vpop.xlane.xlu0 %671 }
 0x26a   : > { %v681_v47 = vpop.xlane.xlu1 %680 }
 0x26b   : > { %v675_v43 = vpop.xlane.xlu0 %674 }
 0x26f   : > { %v690_v44 = vpop.xlane.xlu0 %689 }
 0x271   : > { %v687_v49 = vpop.xlane.xlu1 %686 }
 0x273   : > { %v684_v46 = vpop.xlane.xlu0 %683 }
 0x275   : > { %v722_v53 = vpop.permute.xlu1 %721 }
 0x276   : > { %v1346_v55 = vrot.slane %v722_v53, %v726_v28  ;;  %v864_v28 = vadd.s32 4294967176, %v1342_v52 }
 0x277   : > { %v693_v50 = vpop.xlane.xlu0 %692 }
 0x278   : > { %v728_v59 = vadd.f32 %v1346_v55, %v672_v42  ;;  %v729_v60 = vadd.f32 %v1346_v55, %v675_v43  ;;  %v730_v63 = vadd.f32 %v1346_v55, %v678_v45  ;;  %v731_v7 = vadd.f32 %v1346_v55, %v681_v47 }
 0x279   : > { %v732_v11 = vadd.f32 %v1346_v55, %v684_v46  ;;  %v733_v17 = vadd.f32 %v1346_v55, %v687_v49  ;;  %v734_v24 = vadd.f32 %v1346_v55, %v690_v44  ;;  %v735_v33 = vadd.f32 %v1346_v55, %v693_v50 }
 0x27a   : > { %v765_v1 = vrot.slane %v728_v59, %v764_v61  ;;  %v770_v2 = vrot.slane %v729_v60, %v769_v62  ;;  %v777_v5 = vrot.slane %v730_v63, %v776_v0  ;;  %v784_v15 = vrot.slane %v731_v7, %v783_v9 }
 0x27b   : > { %v1344_v54 = vpop.xlane.xlu0 %701  ;;  %v791_v20 = vrot.slane %v732_v11, %v790_v13  ;;  %v798_v29 = vrot.slane %v733_v17, %v797_v19  ;;  %v805_v34 = vrot.slane %v734_v24, %v804_v21  ;;  %v812_v22 = vrot.slane %v735_v33, %v811_v32 }
 0x27c   : > { %v772_v8 = vsel %vm771_vm2, %v770_v2, %v765_v1  ;;  %v836_v42 = vadd.s32 4294967208, %v1342_v52  ;;  %v843_v44 = vadd.s32 4294967200, %v1342_v52  ;;  %v850_v47 = vadd.s32 4294967192, %v1342_v52 }
 0x27d   : > { %v779_v12 = vsel %vm778_vm3, %v777_v5, %v772_v8  ;;  %v738_v49 = vadd.f32 %v1346_v55, %v1344_v54  ;;  %v857_v50 = vadd.s32 4294967184, %v1342_v52  ;;  %v867_v2 = vsub.s32 %v864_v28, %v1339_v51 }
 0x27e   : > { %v786_v18 = vsel %vm785_vm4, %v784_v15, %v779_v12  ;;  %v839_v53 = vsub.s32 %v836_v42, %v1339_v51  ;;  %v846_v57 = vsub.s32 %v843_v44, %v1339_v51  ;;  %v853_v62 = vsub.s32 %v850_v47, %v1339_v51 }
 0x27f   : > { %v696_v58 = vpop.xlane.xlu0 %695  ;;  %v793_v25 = vsel %vm792_vm5, %v791_v20, %v786_v18  ;;  %v833_v52 = vrot.slane %v738_v49, %v832_v48  ;;  %v860_v0 = vsub.s32 %v857_v50, %v1339_v51 }
 0x280   : > { %v800_v31 = vsel %vm799_vm6, %v798_v29, %v793_v25  ;;  %v736_v36 = vadd.f32 %v1346_v55, %v696_v58 }
 0x281   : > { %v807_v39 = vsel %vm806_vm7, %v805_v34, %v800_v31 }
 0x282   : > { %v819_v43 = vrot.slane %v736_v36, %v818_v35  ;;  %v814_v45 = vsel %vm813_vm8, %v812_v22, %v807_v39 }
 0x283   : > { %v699_v4 = vpop.xlane.xlu0 %698 }
 0x284   : > { %v737_v38 = vadd.f32 %v1346_v55, %v699_v4  ;;  %v821_v56 = vsel %vm820_vm9, %v819_v43, %v814_v45 }
 0x286   : > { %v826_v46 = vrot.slane %v737_v38, %v825_v37 }
 0x287   : > { %v714_v14 = vpop.xlane.xlu0 %713 }
 0x288   : > { %v828_v61 = vsel %vm827_vm10, %v826_v46, %v821_v56  ;;  %v742_v1 = vadd.f32 %v1346_v55, %v714_v14 }
 0x289   : > { %v835_v6 = vsel %vm834_vm11, %v833_v52, %v828_v61 }
 0x28a   : > { %v861_v9 = vrot.slane %v742_v1, %v860_v0 }
 0x28b   : > { %v708_v27 = vpop.xlane.xlu0 %707 }
 0x28c   : > { %v740_v58 = vadd.f32 %v1346_v55, %v708_v27 }
 0x28e   : > { %v847_v5 = vrot.slane %v740_v58, %v846_v57 }
 0x28f   : > { %v711_v41 = vpop.xlane.xlu0 %710 }
 0x290   : > { %v741_v54 = vadd.f32 %v1346_v55, %v711_v41 }
 0x292   : > { %v854_v7 = vrot.slane %v741_v54, %v853_v62 }
 0x293   : > { %v717_v59 = vpop.xlane.xlu0 %716 }
 0x294   : > { %v743_v3 = vadd.f32 %v1346_v55, %v717_v59 }
 0x296   : > { %v868_v51 = vrot.slane %v743_v3, %v867_v2 }
 0x2a6   : > { %v705_v60 = vpop.xlane.xlu1 %704 }
 0x2a7   : > { %v739_v63 = vadd.f32 %v1346_v55, %v705_v60 }
 0x2a9   : > { %v840_v4 = vrot.slane %v739_v63, %v839_v53 }
 0x2ab   : > { %v842_v8 = vsel %vm841_vm12, %v840_v4, %v835_v6 }
 0x2ac   : > { %v849_v10 = vsel %vm848_vm13, %v847_v5, %v842_v8 }
 0x2ad   : > { %v856_v11 = vsel %vm855_vm14, %v854_v7, %v849_v10 }
 0x2ae   : > { %v863_v55 = vsel %vm862_vm15, %v861_v9, %v856_v11 }
 0x2af   : > { %v870_v12 = vsel %vm869_vm0, %v868_v51, %v863_v55 }
 0x2b0   : > { %872 = vst [vmem:[%s285_s18] sm:$0x1] %v870_v12 }
 0x2b1   : > { %1087 = shalt.err (!%p1084_p3)
}
 0x2b2   : > { %s1088_s16 = scalar_lea.hbm %s1404_s22, 16  ;;  %s1092_s14 = scalar_lea.hbm %s1455_s7, 32 }
 0x2b3   : > { %p1089_p4 = scmp.ne.s32.totalorder %s1404_s22, %s1088_s16  ;;  %p1093_p9 = scmp.lt.u32.totalorder %s1404_s22, %s1455_s7 }
 0x2b4   : > { %p1094_p10 = scmp.lt.u32.totalorder %s1092_s14, %s1088_s16  ;;  %p1096_p12 = scmp.lt.u32.totalorder %s1088_s16, %s1404_s22 }
 0x2b5   : > { %p1090_p7 = pnand %p1089_p4, %p1218_p5 }
 0x2b6   : > { %p1095_p11 = por %p1094_p10, %p1093_p9 }
 0x2b7   : > { %p1091_p8 = pneg %p1090_p7 }
 0x2b8   : > { %p1097_p13 = por %p1096_p12, %p1095_p11 }
 0x2ba   : > { %p1098_p0 = pnand %p1097_p13, %p1091_p8 }
 0x2bc   : > { %1101 = shalt.err (!%p1098_p0)
}
 0x2bd   : > { %1029 = dma.vmem_to_hbm [thread:$0]  (%p1218_p5), %s1406_s19, 16, %s1404_s22, %s874_s23  }
 0x2be PF: > { %p1035_p1 = scmp.ge.s32.totalorder %s1136_s29, 2  ;;  %s898_s18 = sand.u32 1, %s1124_s26  }
 0x2bf   : > { %s899_s20 = scalar_lea.sflag [#allocation4], %s898_s18 }
 0x2c0   : > { %p1032_p2 = pnand %p1035_p1, %p1222_p6 }
 0x2c2   : > { %1119 = dma.done.wait (!%p1032_p2), %s899_s20, 16  }
 0x2c3   : > { %1121 = vsyncadd (!%p1032_p2), %s899_s20, 4294967280  ;;  %p19_p3 = scmp.ge.s32.totalorder %s1206_s8, 4   ;;  %s1458_s26 = smov %s1128_s27 }
 0x2c4   : > { %s1459_s27 = smov %s1132_s28  ;;  %s1460_s28 = smov %s1216_s11 }
 0x2c5   : > { %s1461_s29 = smov %s1206_s8  ;;  %21 = sbr.rel (!%p19_p3) target bundleno = 6 (0x6), region = 83 }
 0x2cc   :  { %903 = vsyncpa [#allocation4], 1 }
 0x2cd   :  { %905 = vsyncpa [#allocation4 + $0x1], 1 }

</bundles_post_ra>
